<compile_context>
chip_gen: v7x
topology: tpu7x:2x2x1
jax: 0.10.0
libtpu: 0.0.40
codegen_flags: <defaults>
</compile_context>

<pallas_src>
import jax
import jax.numpy as jnp
from jax.experimental import pallas as pl
from jax.experimental.pallas import tpu as pltpu


# ---------------------------------------------------------------------------
# helpers
# ---------------------------------------------------------------------------

def _round_up(n, m):
    return (n + m - 1) // m * m


def _cdiv(a, b):
    return -(-a // b)


def _chip_traits():
    """Best-effort chip detection; falls back to conservative 1-core/f32."""
    kind = ""
    try:
        kind = jax.devices()[0].device_kind.lower()
    except Exception:  # pragma: no cover - detection is best-effort only
        pass
    is_v5e = ("v5 lite" in kind) or ("v5e" in kind) or ("v5litepod" in kind)
    # Megacore / dual-TC chips: dimension_semantics=("parallel",) shards the
    # batch grid axis across both TensorCores.
    multi_core = any(tag in kind for tag in ("v7", " v4", "v5p"))
    num_cores = 2 if multi_core else 1
    # Stay well inside the default scoped-VMEM limit (16 MiB v5e, 32 MiB
    # v6e/v7x) accounting for double-buffered x/out tiles.
    vmem_budget = (12 if is_v5e else 24) * 1024 * 1024
    return {"kind": kind, "is_v5e": is_v5e, "num_cores": num_cores,
            "vmem_budget": vmem_budget}


_MIN_ROWS_PER_CORE_SPLIT = 1024   # don't shard across TCs below this work size
_XLA_FASTPATH_MAX_ROWS = 256      # below this, plain XLA beats a custom call


def _pick_tiling(batch, zd, xd, x_bytes, out_bytes, traits, tb=None):
    """Return (batch_tile, n_steps) with padding bounded to a few rows."""
    b8 = _round_up(max(batch, 1), 8)
    if tb is not None:
        tb_v = max(8, _round_up(tb, 8))
        return tb_v, _cdiv(b8, tb_v)

    # Double-buffered activation + output tiles are the only VMEM consumers
    # that scale with the batch tile (fused W + bias are ~17 KiB, resident).
    bytes_per_row = 2 * (zd * x_bytes + xd * out_bytes)
    tb_max = (traits["vmem_budget"] // bytes_per_row) // 8 * 8
    tb_max = max(512, min(8192, tb_max))

    n_steps = _cdiv(b8, tb_max)
    nc = traits["num_cores"]
    if nc > 1 and b8 >= nc * _MIN_ROWS_PER_CORE_SPLIT:
        # Even step count so both TensorCores get equal tiles.
        n_steps = _round_up(n_steps, nc)
    tb_v = _round_up(_cdiv(b8, n_steps), 8)
    return tb_v, n_steps


# ---------------------------------------------------------------------------
# kernel
# ---------------------------------------------------------------------------

def _generator_x_kernel(x_ref, w_ref, b_ref, o_ref):
    # One MXU matmul per batch tile with f32 accumulation; bias is already f32
    # so the epilogue is a single VPU add + store-dtype cast.
    acc = jnp.dot(x_ref[...], w_ref[...], preferred_element_type=jnp.float32)
    o_ref[...] = (acc + b_ref[...]).astype(o_ref.dtype)


# ---------------------------------------------------------------------------
# parameter fusion (call ONCE at parameter-load time, not per forward)
# ---------------------------------------------------------------------------

def fuse_generator_x_params(params, *, compute_dtype=None):
    """Fuse W1@W2@W3@W4 (f32, HIGHEST precision) and the bias, once.

    Returns {"w": (zd, xd) [compute_dtype or f32], "b": (1, xd) f32}.
    """
    hp = jax.lax.Precision.HIGHEST
    f32 = jnp.float32
    w = jnp.dot(params["w1"].astype(f32), params["w2"].astype(f32), precision=hp)
    w = jnp.dot(w, params["w3"].astype(f32), precision=hp)
    w = jnp.dot(w, params["w4"].astype(f32), precision=hp)       # (zd, xd)
    b = params["b4"].astype(f32).reshape(1, -1)                  # (1, xd) f32
    if compute_dtype is not None:
        w = w.astype(compute_dtype)
    return {"w": w, "b": b}


# ---------------------------------------------------------------------------
# forward
# ---------------------------------------------------------------------------

def generator_x_forward(x, fused, *, out_dtype=None, compute_dtype=None,
                        tb=None, force_pallas=False):
    """GeneratorX.forward using the cached fused weight.

    x:             (B, zd)
    fused:         output of fuse_generator_x_params
    out_dtype:     output dtype (default: x.dtype). bf16 halves HBM writeback.
    compute_dtype: dtype for x / W reads (accumulation stays f32).
                   Defaults to bf16 on v5e, otherwise x.dtype.
    tb:            optional batch-tile override (rounded up to a multiple of 8)
    force_pallas:  skip the tiny-batch plain-XLA fast path.
    """
    w, b = fused["w"], fused["b"]
    B, zd = x.shape
    xd = w.shape[1]
    out_dtype = out_dtype if out_dtype is not None else x.dtype
    traits = _chip_traits()

    if compute_dtype is None and traits["is_v5e"]:
        compute_dtype = jnp.bfloat16        # lowest HBM BW -> bf16 reads win
    if compute_dtype is not None:
        if x.dtype != compute_dtype:
            x = x.astype(compute_dtype)
        if w.dtype != compute_dtype:
            w = w.astype(compute_dtype)

    # Tiny batch: a custom call + grid step costs more than the whole matmul.
    if (not force_pallas) and B <= _XLA_FASTPATH_MAX_ROWS:
        acc = jnp.dot(x, w, preferred_element_type=jnp.float32)
        return (acc + b).astype(out_dtype)

    x_bytes = jnp.dtype(x.dtype).itemsize
    out_bytes = jnp.dtype(out_dtype).itemsize
    tb_v, n_steps = _pick_tiling(B, zd, xd, x_bytes, out_bytes, traits, tb)
    Bp = tb_v * n_steps
    if Bp != B:
        # Linear op: zero-padded rows are harmless and sliced away afterwards.
        x = jnp.pad(x, ((0, Bp - B), (0, 0)))

    cost = pl.CostEstimate(
        flops=2 * B * zd * xd + B * xd,
        transcendentals=0,
        bytes_accessed=(B * zd * x_bytes                 # x
                        + zd * xd * jnp.dtype(w.dtype).itemsize   # fused W
                        + xd * 4                          # bias (f32)
                        + B * xd * out_bytes),            # out
    )

    out_p = pl.pallas_call(
        _generator_x_kernel,
        out_shape=jax.ShapeDtypeStruct((Bp, xd), out_dtype),
        grid_spec=pltpu.PrefetchScalarGridSpec(
            num_scalar_prefetch=0,
            grid=(n_steps,),
            in_specs=[
                # activations: tiled over the batch axis (auto-pipelined)
                pl.BlockSpec((tb_v, zd), lambda i: (i, 0)),
                # fused weight + bias: tiny constants, whole-array resident in
                # VMEM (no per-step double-buffering / DMA descriptors)
                pl.BlockSpec(memory_space=pltpu.MemorySpace.VMEM),
                pl.BlockSpec(memory_space=pltpu.MemorySpace.VMEM),
            ],
            out_specs=pl.BlockSpec((tb_v, xd), lambda i: (i, 0)),
        ),
        compiler_params=pltpu.CompilerParams(
            dimension_semantics=("parallel",)),
        cost_estimate=cost,
    )(x, w, b)

    return out_p[:B] if Bp != B else out_p


# ---------------------------------------------------------------------------
# parameter init + pure-JAX reference (unfused 4-matmul chain)
# ---------------------------------------------------------------------------

def init_generator_x_params(key, zd=16, xd=256, dtype=jnp.float32):
    """Deterministic synthetic parameters matching the PyTorch module shapes.

    PyTorch: W1 (4zd, zd), W2 (8zd, 4zd), W3 (16zd, 8zd), W4 (xd, 16zd), b4 (xd,).
    Stored pre-transposed as (in, out); bias as (1, xd).
    """
    k1, k2, k3, k4, k5 = jax.random.split(key, 5)
    dims = [zd, 4 * zd, 8 * zd, 16 * zd, xd]

    def linear_w(k, fan_in, fan_out):
        bound = 1.0 / jnp.sqrt(fan_in)
        return jax.random.uniform(k, (fan_in, fan_out), dtype,
                                  minval=-bound, maxval=bound)

    w1 = linear_w(k1, dims[0], dims[1])
    w2 = linear_w(k2, dims[1], dims[2])
    w3 = linear_w(k3, dims[2], dims[3])
    w4 = linear_w(k4, dims[3], dims[4])
    b_bound = 1.0 / jnp.sqrt(dims[3])
    b4 = jax.random.uniform(k5, (1, dims[4]), dtype,
                            minval=-b_bound, maxval=b_bound)
    return {"w1": w1, "w2": w2, "w3": w3, "w4": w4, "b4": b4}


def generator_x_reference(x, params):
    """Original unfused 4-matmul chain in full f32 precision."""
    hp = jax.lax.Precision.HIGHEST
    h = jnp.dot(x, params["w1"], precision=hp)
    h = jnp.dot(h, params["w2"], precision=hp)
    h = jnp.dot(h, params["w3"], precision=hp)
    return jnp.dot(h, params["w4"], precision=hp) + params["b4"]


# ---------------------------------------------------------------------------
# demo / self-test
# ---------------------------------------------------------------------------

if __name__ == "__main__":
    zd, xd = 16, 256
    batch = 20  # not a multiple of 8 -> exercises padding

    key = jax.random.PRNGKey(0)
    k_params, k_x = jax.random.split(key)
    params = init_generator_x_params(k_params, zd=zd, xd=xd)
    x = jax.random.normal(k_x, (batch, zd), jnp.float32)

    ref = generator_x_reference(x, params)

    # Fuse once at "load time" (this is the whole point of the refactor).
    fused = fuse_generator_x_params(params)

    # 1) Pallas kernel, f32 compute + f32 output, single grid step.
    out = jax.block_until_ready(
        generator_x_forward(x, fused, compute_dtype=jnp.float32,
                            force_pallas=True))
    assert out.shape == (batch, xd) and out.dtype == jnp.float32
    assert jnp.allclose(out, ref, atol=1e-3, rtol=1e-3)

    # 2) Pallas kernel, multi-step grid via tile override (exercises batch
    #    tiling + padding + auto-pipelining).
    out_tiled = jax.block_until_ready(
        generator_x_forward(x, fused, compute_dtype=jnp.float32,
                            force_pallas=True, tb=8))
    assert out_tiled.shape == (batch, xd)
    assert jnp.allclose(out_tiled, ref, atol=1e-3, rtol=1e-3)

    # 3) Pallas kernel, bf16 reads + bf16 output (halved HBM traffic).
    fused_bf16 = fuse_generator_x_params(params, compute_dtype=jnp.bfloat16)
    out_bf16 = jax.block_until_ready(
        generator_x_forward(x.astype(jnp.bfloat16), fused_bf16,
                            out_dtype=jnp.bfloat16,
                            compute_dtype=jnp.bfloat16,
                            force_pallas=True))
    assert out_bf16.shape == (batch, xd) and out_bf16.dtype == jnp.bfloat16
    assert jnp.allclose(out_bf16.astype(jnp.float32), ref, atol=5e-2, rtol=5e-2)

    # 4) Default dispatch: tiny batch takes the plain-XLA fast path.
    out_xla = jax.block_until_ready(
        generator_x_forward(x, fused, compute_dtype=jnp.float32))
    assert jnp.allclose(out_xla, ref, atol=1e-3, rtol=1e-3)

    print("KERNEL_OK")
</pallas_src>

<mosaic_0001>
module attributes {stable_mosaic.version = 11 : i64} {
  func.func @_generator_x_kernel(%arg0: i32, %arg1: memref<24x16xf32, #tpu.memory_space<vmem>>, %arg2: memref<16x256xf32, #tpu.memory_space<vmem>>, %arg3: memref<1x256xf32, #tpu.memory_space<vmem>>, %arg4: memref<24x256xf32, #tpu.memory_space<vmem>>) attributes {dimension_semantics = [#tpu.dimension_semantics<parallel>], iteration_bounds = array<i64: 1>, scalar_prefetch = 0 : i64, scratch_operands = 0 : i64, tpu.core_type = #tpu.core_type<tc>, window_params = [{transform_indices = @transform_0, window_bounds = array<i64: 24, 16>}, {pipeline_mode = #tpu.pipeline_mode<synchronous>, transform_indices = @transform_1, window_bounds = array<i64: 16, 256>}, {pipeline_mode = #tpu.pipeline_mode<synchronous>, transform_indices = @transform_2, window_bounds = array<i64: 1, 256>}, {transform_indices = @transform_3, window_bounds = array<i64: 24, 256>}]} {
    %c0 = arith.constant 0 : index
    %c0_0 = arith.constant 0 : index
    %0 = vector.load %arg1[%c0, %c0_0] : memref<24x16xf32, #tpu.memory_space<vmem>>, vector<24x16xf32>
    %c0_1 = arith.constant 0 : index
    %c0_2 = arith.constant 0 : index
    %1 = vector.load %arg2[%c0_1, %c0_2] : memref<16x256xf32, #tpu.memory_space<vmem>>, vector<16x256xf32>
    %cst = arith.constant dense<0.000000e+00> : vector<24x256xf32>
    %2 = tpu.matmul %0, %1, %cst {dimension_numbers = #tpu.dot_dimension_numbers<[1], [0], [0], [1], [0, 0, 1, 1], [], []>} : vector<24x16xf32>, vector<16x256xf32>, vector<24x256xf32> -> vector<24x256xf32>
    %c0_3 = arith.constant 0 : index
    %c0_4 = arith.constant 0 : index
    %3 = vector.load %arg3[%c0_3, %c0_4] : memref<1x256xf32, #tpu.memory_space<vmem>>, vector<1x256xf32>
    %4 = vector.broadcast %3 : vector<1x256xf32> to vector<24x256xf32>
    %5 = arith.addf %2, %4 : vector<24x256xf32>
    %c0_5 = arith.constant 0 : index
    %c0_6 = arith.constant 0 : index
    %6 = vector.load %arg4[%c0_5, %c0_6] : memref<24x256xf32, #tpu.memory_space<vmem>>, vector<24x256xf32>
    tpu.vector_store %arg4[%c0_5, %c0_6], %5 {strides = array<i32>} : memref<24x256xf32, #tpu.memory_space<vmem>>, vector<24x256xf32>,
    return
  }
  func.func @transform_0(%arg0: i32) -> (i32, i32) {
    %c0_i32 = arith.constant 0 : i32
    %c0_i32_0 = arith.constant 0 : i32
    return %arg0, %c0_i32 : i32, i32
  }
  func.func @transform_1(%arg0: i32) -> (i32, i32) {
    %c0_i32 = arith.constant 0 : i32
    %c0_i32_0 = arith.constant 0 : i32
    %c0_i32_1 = arith.constant 0 : i32
    return %c0_i32, %c0_i32_0 : i32, i32
  }
  func.func @transform_2(%arg0: i32) -> (i32, i32) {
    %c0_i32 = arith.constant 0 : i32
    %c0_i32_0 = arith.constant 0 : i32
    %c0_i32_1 = arith.constant 0 : i32
    return %c0_i32, %c0_i32_0 : i32, i32
  }
  func.func @transform_3(%arg0: i32) -> (i32, i32) {
    %c0_i32 = arith.constant 0 : i32
    %c0_i32_0 = arith.constant 0 : i32
    return %arg0, %c0_i32 : i32, i32
  }
}

</mosaic_0001>

<bundles_post_ra>
// kernel: tpu_custom_call.1
= control target key start
LH: loop header
LB: loop body
LE: loop exit
PB: predicated region body
PF: predicated region fallthrough
CT: control target
= control target key end

     0   :  { %v186_v5 = vmov 0.0   ;;  %s246_s0 = inlined_call_operand.vmem [shape: f32[24,16], index: 0, kind: input, shape index: {}]   ;;  %s247_s1 = inlined_call_operand.vmem [shape: f32[16,256], index: 1, kind: input, shape index: {}]   ;;  %s248_s2 = inlined_call_operand.vmem [shape: f32[1,256], index: 2, kind: input, shape index: {}]   ;;  %s249_s3 = inlined_call_operand.hbm [shape: f32[24,256], index: 3, kind: output, shape index: {}]  }
   0x1   :  { %v19_v0 = vld [vmem:[%s247_s1 + $0x8] sm:$0xff]  ;;  %v21_v1 = vld [vmem:[%s247_s1 + $0x18] sm:$0xff]  ;;  %v18_v2 = vld [vmem:[%s247_s1] sm:$0xff]  ;;  %114 = vmatprep.mubr.f32.mxu1 %v186_v5  ;;  %108 = vmatprep.mubr.f32.mxu0 %v186_v5 }
   0x2   :  { %v152_v3 = vpack.c.bf16 %v21_v1, %v19_v0  ;;  %v20_v4 = vld [vmem:[%s247_s1 + $0x10] sm:$0xff] }
   0x3   :  { %v154_v6 = vpack.c.bf16 %v20_v4, %v18_v2 }
   0x4   :  { %8 = vsyncpa [#allocation3], 0  ;;  %156 = vmatprep.subr.bf16.mxu1 %v152_v3  ;;  %153 = vmatprep.subr.bf16.mxu0 %v152_v3  ;;  %v16_v7 = vld [vmem:[%s246_s0 + $0x8] sm:$0xff]  ;;  %vm34_vm0 = vcmask 130048   ;;  %v15_v8 = vld [vmem:[%s246_s0] sm:$0xff]  ;;  %v24_v10 = vlaneseq }
   0x5   :  { %157 = vmatpush1.bf16.msra.mxu1 %v154_v6  ;;  %155 = vmatpush1.bf16.msra.mxu0 %v154_v6  ;;  %v17_v9 = vld [vmem:[%s246_s0 + $0x10] sm:$0xff]  ;;  %v22_v13 = vld [vmem:[%s248_s2] sm:$0x3]  ;;  %s187_s0 = smov [#allocation2]  }
   0x6   :  { %v25_v11 = vshrl.u32 %v24_v10, 7  ;;  %s138_s27 = sshll.u32 %s187_s0, 4  ;;  %s139_s27 = int_to_ptr.vmem [resolvable:$true] %s138_s27 }
   0x7   :  { %s162_s2 = scalar_lea.vmem %s139_s27, 768  ;;  %p167_p1 = scmp.lt.s32.totalorder %s139_s27, %s139_s27 }
   0x8   :  { %150 = vmatmul.mubr.msk.f32.vlgmr.msra.gmra.mrb[0].mxu1 %vm34_vm0, %v16_v7  ;;  %149 = vmatmul.mubr.msk.f32.vlgmr.msra.gmra.mrb[0].mxu0 %vm34_vm0, %v15_v8  ;;  %v26_v12 = vsub.s32 0, %v25_v11  ;;  %v30_v14 = vsub.s32 1, %v25_v11  ;;  %p163_p0 = scmp.ne.s32.totalorder %s139_s27, %s162_s2  ;;  %p168_p2 = scmp.lt.s32.totalorder %s162_s2, %s162_s2 }
   0x9   :  { %120 = vmatprep.mubr.f32.mxu1 %v186_v5 }
   0xa   :  { %v27_v15 = vrot.slane %v22_v13, %v26_v12  ;;  %v31_v16 = vrot.slane %v22_v13, %v30_v14  ;;  %p169_p3 = por %p168_p2, %p167_p1 }
   0xc   :  { %151 = vmatmul.mubr.msk.f32.gmra.mrb[2].mxu1 %vm34_vm0, %v17_v9  ;;  %p170_p4 = pnand %p169_p3, %p163_p0 }
  0xdb   :  { %v116_v17 = vpop.f32.mrb[0].mxu1  ;;  %v110_v18 = vpop.f32.mrb[0].mxu0 }
  0xdc   :  { %v117_v19 = vadd.f32 %v116_v17, %v27_v15  ;;  %v118_v20 = vpop.f32.mrb[1].mxu1  ;;  %v111_v21 = vadd.f32 %v110_v18, %v27_v15  ;;  %v112_v22 = vpop.f32.mrb[1].mxu0 }
  0xdd   :  { %v119_v23 = vadd.f32 %v118_v20, %v31_v16  ;;  %v113_v24 = vadd.f32 %v112_v22, %v31_v16 }
  0xde   :  { %129 = vst [vmem:[#allocation2 + $0x10] sm:$0xff] %v117_v19  ;;  %127 = vst [vmem:[#allocation2] sm:$0xff] %v111_v21 }
  0xdf   :  { %130 = vst [vmem:[#allocation2 + $0x18] sm:$0xff] %v119_v23  ;;  %128 = vst [vmem:[#allocation2 + $0x8] sm:$0xff] %v113_v24  ;;  %v122_v25 = vpop.f32.mrb[2].mxu1 }
  0xe0   :  { %v123_v26 = vadd.f32 %v122_v25, %v27_v15  ;;  %v124_v27 = vpop.f32.mrb[3].mxu1 }
  0xe1   :  { %v125_v28 = vadd.f32 %v124_v27, %v31_v16 }
  0xe2   :  { %131 = vst [vmem:[#allocation2 + $0x20] sm:$0xff] %v123_v26 }
  0xe3   :  { %132 = vst [vmem:[#allocation2 + $0x28] sm:$0xff] %v125_v28 }
  0xe4   :  { %173 = shalt.err (!%p170_p4)
}
  0xe5   :  { %s174_s30 = scalar_lea.hbm %s249_s3, 768 }
  0xe6   :  { %p175_p5 = scmp.ne.s32.totalorder %s249_s3, %s174_s30  ;;  %p178_p6 = scmp.lt.u32.totalorder %s174_s30, %s249_s3 }
  0xe8   :  { %p180_p7 = pnand %p178_p6, %p175_p5 }
  0xea   :  { %183 = shalt.err (!%p180_p7)
}
  0xeb   :  { %s188_s8 = smov 256   ;;  %s189_s9 = smov 16  }
  0xec   :  { %144 = dma.vmem_to_hbm [thread:$0]  %s139_s27, 768, %s249_s3, [#allocation3], %s188_s8, %s188_s8, %s189_s9  }
  0xed   :  { %184 = dma.done.wait [#allocation3], 768  }
  0xee   :  { %185 = vsyncadd [#allocation3], 4294966528 }
  0xef   :  { %148 = vsyncpa [#allocation3], 1 }

</bundles_post_ra>
